<compile_context>
chip_gen: v7x
topology: tpu7x:2x2x1
jax: 0.10.0
libtpu: 0.0.40
codegen_flags: <defaults>
</compile_context>

<pallas_src>
import functools

import jax
import jax.numpy as jnp
from jax import lax
from jax.experimental import pallas as pl
from jax.experimental.pallas import tpu as pltpu

ASV_DIM = 3


def _round_up(v: int, m: int) -> int:
    return (v + m - 1) // m * m


# ---------------------------------------------------------------------------
# Kernel 1: fused backbone = conv3x3(+bias) + ReLU + global average pool.
# grid = (B, n_spatial_tiles); flattened H*W spatial lives on the lane axis.
# ---------------------------------------------------------------------------
def backbone_kernel(p_ref,     # (9C, TN)   bf16  transposed im2col patches (tile)
                    w_ref,     # (Cmid, 9C) bf16  conv weights, transposed
                    b_ref,     # (Cmid, 1)  f32   conv bias
                    feat_ref,  # (Cmid, 1)  f32   pooled features (this batch)
                    acc_ref,   # (Cmid, 1)  f32   scratch: pooled-sum accumulator
                    *, lane_tile: int, hw_valid: int):
    t = pl.program_id(1)

    @pl.when(t == 0)
    def _init():
        acc_ref[...] = jnp.zeros_like(acc_ref)

    # Single merged K=9C matmul; the H*W tile is the lane/N axis.
    y = jnp.dot(w_ref[...], p_ref[...], preferred_element_type=jnp.float32)
    y = jnp.maximum(y + b_ref[...], 0.0)                        # bias + ReLU (f32)

    # Mask spatial-padding lanes so they don't pollute the average pool.
    pos = t * lane_tile + lax.broadcasted_iota(jnp.int32, (1, lane_tile), 1)
    y = jnp.where(pos < hw_valid, y, 0.0)

    # Global-average-pool partial sum: lane reduction (XLU slot).
    acc_ref[...] += jnp.sum(y, axis=-1, keepdims=True)

    @pl.when(t == pl.num_programs(1) - 1)
    def _finalize():
        feat_ref[...] = acc_ref[...] * (1.0 / float(hw_valid))


# ---------------------------------------------------------------------------
# Kernel 2: batched head = concat([feat, asv]) -> fc1+ReLU -> fc2 -> softmax.
# One call over the whole batch (M = B), hoisted out of the per-batch grid.
# ---------------------------------------------------------------------------
def head_kernel(feat_ref,    # (B, Cmid)     f32
                asv_ref,     # (B, ASV_DIM)  f32
                fc1_wf_ref,  # (Cmid, NH)    bf16
                fc1_wa_ref,  # (ASV_DIM, NH) bf16
                fc1_b_ref,   # (1, NH)       f32
                fc2_w_ref,   # (NH, OUT)     bf16
                fc2_b_ref,   # (1, OUT)      f32
                out_ref,     # (B, OUT)      f32
                *, num_modes: int, training: bool):
    # fc1 over concat([features, agent_state_vector]) as a split batched matmul.
    h = (jnp.dot(feat_ref[...].astype(jnp.bfloat16), fc1_wf_ref[...],
                 preferred_element_type=jnp.float32)
         + jnp.dot(asv_ref[...].astype(jnp.bfloat16), fc1_wa_ref[...],
                   preferred_element_type=jnp.float32)
         + fc1_b_ref[...])
    h = jnp.maximum(h, 0.0)

    pred = jnp.dot(h.astype(jnp.bfloat16), fc2_w_ref[...],
                   preferred_element_type=jnp.float32) + fc2_b_ref[...]

    if not training:
        # Softmax over only the trailing num_modes columns (exact normalization).
        traj_dim = pred.shape[-1] - num_modes
        col = lax.broadcasted_iota(jnp.int32, pred.shape, 1)
        is_mode = col >= traj_dim
        m = jnp.max(jnp.where(is_mode, pred, -jnp.inf), axis=-1, keepdims=True)
        e = jnp.exp(jnp.where(is_mode, pred - m, -jnp.inf))     # exp(-inf) == 0
        s = jnp.sum(e, axis=-1, keepdims=True)
        pred = jnp.where(is_mode, e / s, pred)

    out_ref[...] = pred                                          # one full-batch store


def mtp_forward(image_nchw, agent_state_vector, params, *, num_modes: int,
                training: bool = False, lane_tile: int = 2048):
    """MTP forward. image_nchw: (B, C, H, W); agent_state_vector: (B, 3)."""
    conv_w, conv_b, fc1_w, fc1_b, fc2_w, fc2_b = params   # conv_w: (3,3,C,Cmid) HWIO

    B, C, H, W = image_nchw.shape
    Cmid = conv_w.shape[-1]
    n_hidden = fc1_w.shape[-1]
    out_dim = fc2_w.shape[-1]
    hw = H * W

    assert lane_tile % 128 == 0
    lane_tile = min(lane_tile, _round_up(hw, 128))
    hw_pad = _round_up(hw, lane_tile)
    n_tiles = hw_pad // lane_tile

    # ---- host prep: transposed im2col (spatial flattened onto the lane axis) ----
    x = image_nchw.astype(jnp.float32)
    xp = jnp.pad(x, ((0, 0), (0, 0), (1, 1), (1, 1)))             # SAME padding
    patches = jnp.concatenate(
        [xp[:, :, dy:dy + H, dx:dx + W] for dy in range(3) for dx in range(3)],
        axis=1).reshape(B, 9 * C, hw)                             # (B, 9C, H*W)
    patches = jnp.pad(patches, ((0, 0), (0, 0), (0, hw_pad - hw)))
    patches = patches.astype(jnp.bfloat16)

    w_t = jnp.transpose(conv_w, (3, 0, 1, 2)).reshape(Cmid, 9 * C).astype(jnp.bfloat16)
    b_c = conv_b.reshape(Cmid, 1).astype(jnp.float32)

    # ---- backbone kernel: conv + ReLU + global average pool ----
    backbone = functools.partial(backbone_kernel, lane_tile=lane_tile, hw_valid=hw)
    bytes_accessed = int(B * 9 * C * hw_pad * 2 + Cmid * 9 * C * 2
                         + Cmid * 4 + B * Cmid * 4)
    feats = pl.pallas_call(
        backbone,
        grid=(B, n_tiles),
        in_specs=[
            pl.BlockSpec((None, 9 * C, lane_tile), lambda b, t: (b, 0, t)),
            pl.BlockSpec((Cmid, 9 * C), lambda b, t: (0, 0)),
            pl.BlockSpec((Cmid, 1), lambda b, t: (0, 0)),
        ],
        out_specs=pl.BlockSpec((None, Cmid, 1), lambda b, t: (b, 0, 0)),
        out_shape=jax.ShapeDtypeStruct((B, Cmid, 1), jnp.float32),
        scratch_shapes=[pltpu.VMEM((Cmid, 1), jnp.float32)],
        compiler_params=pltpu.CompilerParams(
            dimension_semantics=("parallel", "arbitrary"),
            vmem_limit_bytes=32 * 1024 * 1024),
        cost_estimate=pl.CostEstimate(
            flops=int(2 * B * hw_pad * 9 * C * Cmid),
            transcendentals=0,
            bytes_accessed=bytes_accessed),
    )(patches, w_t, b_c)
    feats = feats.reshape(B, Cmid)

    # ---- head kernel: batched fc1+ReLU, fc2, (inference) softmax ----
    # TODO(synk): at real shapes (backbone_feature_dim~2048, n_hidden=4096) add
    # a K/N tiling grid to this head kernel; at demo shapes one block suffices.
    head = functools.partial(head_kernel, num_modes=num_modes, training=training)
    out = pl.pallas_call(
        head,
        out_shape=jax.ShapeDtypeStruct((B, out_dim), jnp.float32),
    )(feats,
      agent_state_vector.astype(jnp.float32).reshape(B, ASV_DIM),
      fc1_w[:Cmid].astype(jnp.bfloat16),
      fc1_w[Cmid:].astype(jnp.bfloat16),
      fc1_b.reshape(1, n_hidden).astype(jnp.float32),
      fc2_w.astype(jnp.bfloat16),
      fc2_b.reshape(1, out_dim).astype(jnp.float32))
    return out


def mtp_reference(image_nchw, asv, params, *, num_modes: int, training: bool = False):
    """Pure-JAX f32 reference of the same forward pass."""
    conv_w, conv_b, fc1_w, fc1_b, fc2_w, fc2_b = params
    x = jnp.transpose(image_nchw, (0, 2, 3, 1)).astype(jnp.float32)
    y = lax.conv_general_dilated(x, conv_w, window_strides=(1, 1), padding="SAME",
                                 dimension_numbers=("NHWC", "HWIO", "NHWC"))
    y = jnp.maximum(y + conv_b, 0.0)
    feat = jnp.mean(y, axis=(1, 2))                               # global avg pool
    features = jnp.concatenate([feat, asv.astype(jnp.float32)], axis=1)
    h = jnp.maximum(features @ fc1_w + fc1_b, 0.0)
    pred = h @ fc2_w + fc2_b
    traj, modes = pred[:, :-num_modes], pred[:, -num_modes:]
    if not training:
        modes = jax.nn.softmax(modes, axis=-1)
    return jnp.concatenate([traj, modes], axis=1)


if __name__ == "__main__":
    key = jax.random.PRNGKey(0)
    k_img, k_asv, k1, k2, k3, k4, k5, k6 = jax.random.split(key, 8)

    # Small shapes consistent with the module's forward (image NCHW, asv (B,3)).
    B, C, Himg, Wimg = 2, 4, 16, 12      # H*W = 192 -> 2 lane tiles + masked padding
    Cmid = 16                            # backbone feature dim
    n_hidden = 32                        # fc1 hidden size
    num_modes = 3
    seconds, frequency_in_hz = 3.0, 2.0
    preds_per_mode = int(seconds * frequency_in_hz) * 2
    out_dim = num_modes * preds_per_mode + num_modes   # 39

    image = jax.random.normal(k_img, (B, C, Himg, Wimg), jnp.float32)
    asv = jax.random.normal(k_asv, (B, ASV_DIM), jnp.float32)

    def uinit(k, shape, fan_in):
        bound = 1.0 / (fan_in ** 0.5)
        return jax.random.uniform(k, shape, jnp.float32, -bound, bound)

    conv_w = uinit(k1, (3, 3, C, Cmid), 9 * C)     # HWIO conv kernel
    conv_b = uinit(k2, (Cmid,), 9 * C)
    fc1_w = uinit(k3, (Cmid + ASV_DIM, n_hidden), Cmid + ASV_DIM)
    fc1_b = uinit(k4, (n_hidden,), Cmid + ASV_DIM)
    fc2_w = uinit(k5, (n_hidden, out_dim), n_hidden)
    fc2_b = uinit(k6, (out_dim,), n_hidden)
    params = (conv_w, conv_b, fc1_w, fc1_b, fc2_w, fc2_b)

    # lane_tile=128 so the demo exercises the multi-tile pooled accumulator and
    # the spatial-padding mask (192 valid positions padded to 2 x 128 lanes).
    out = mtp_forward(image, asv, params, num_modes=num_modes, training=False,
                      lane_tile=128)
    out = jax.block_until_ready(out)

    assert out.shape == (B, out_dim), out.shape
    # Mode probabilities must sum to 1 in eval mode (exact normalization now).
    assert jnp.allclose(jnp.sum(out[:, -num_modes:], axis=-1), 1.0, atol=1e-5)
    # Compare against the pure-JAX f32 reference (bf16 matmul operands -> drift).
    ref = mtp_reference(image, asv, params, num_modes=num_modes, training=False)
    assert jnp.allclose(out, ref, atol=5e-2, rtol=5e-2), float(
        jnp.max(jnp.abs(out - ref)))
    print("KERNEL_OK")
</pallas_src>

<mosaic_0001>
module attributes {stable_mosaic.version = 11 : i64} {
  func.func @backbone_kernel(%arg0: i32, %arg1: i32, %arg2: memref<1x36x128xbf16, #tpu.memory_space<vmem>>, %arg3: memref<16x36xbf16, #tpu.memory_space<vmem>>, %arg4: memref<16x1xf32, #tpu.memory_space<vmem>>, %arg5: memref<1x16x1xf32, #tpu.memory_space<vmem>>, %arg6: memref<16x1xf32, #tpu.memory_space<vmem>>) attributes {dimension_semantics = [#tpu.dimension_semantics<parallel>, #tpu.dimension_semantics<arbitrary>], iteration_bounds = array<i64: 2, 2>, scalar_prefetch = 0 : i64, scratch_operands = 1 : i64, tpu.core_type = #tpu.core_type<tc>, window_params = [{transform_indices = @transform_0, window_bounds = array<i64: 1, 36, 128>}, {pipeline_mode = #tpu.pipeline_mode<synchronous>, transform_indices = @transform_1, window_bounds = array<i64: 16, 36>}, {pipeline_mode = #tpu.pipeline_mode<synchronous>, transform_indices = @transform_2, window_bounds = array<i64: 16, 1>}, {transform_indices = @transform_3, window_bounds = array<i64: 1, 16, 1>}]} {
    %c0_i32 = arith.constant 0 : i32
    %0 = arith.cmpi eq, %arg1, %c0_i32 : i32
    %1 = arith.extui %0 : i1 to i32
    %c0_i32_0 = arith.constant 0 : i32
    %2 = arith.cmpi ne, %1, %c0_i32_0 : i32
    scf.if %2 {
      %cst_15 = arith.constant 0.000000e+00 : f32
      %30 = vector.broadcast %cst_15 : f32 to vector<16x1xf32>
      %c0_16 = arith.constant 0 : index
      %c0_17 = arith.constant 0 : index
      %31 = vector.load %arg6[%c0_16, %c0_17] : memref<16x1xf32, #tpu.memory_space<vmem>>, vector<16x1xf32>
      tpu.vector_store %arg6[%c0_16, %c0_17], %30 {strides = array<i32>} : memref<16x1xf32, #tpu.memory_space<vmem>>, vector<16x1xf32>,
    } else {
    }
    %c0 = arith.constant 0 : index
    %c0_1 = arith.constant 0 : index
    %3 = vector.load %arg3[%c0, %c0_1] : memref<16x36xbf16, #tpu.memory_space<vmem>>, vector<16x36xbf16>
    %c0_2 = arith.constant 0 : index
    %c0_3 = arith.constant 0 : index
    %c0_4 = arith.constant 0 : index
    %4 = vector.load %arg2[%c0_2, %c0_3, %c0_4] : memref<1x36x128xbf16, #tpu.memory_space<vmem>>, vector<1x36x128xbf16>
    %5 = vector.shape_cast %4 : vector<1x36x128xbf16> to vector<36x128xbf16>
    %cst = arith.constant dense<0.000000e+00> : vector<16x128xf32>
    %6 = tpu.matmul %3, %5, %cst {dimension_numbers = #tpu.dot_dimension_numbers<[1], [0], [0], [1], [0, 0, 1, 1], [], []>} : vector<16x36xbf16>, vector<36x128xbf16>, vector<16x128xf32> -> vector<16x128xf32>
    %c0_5 = arith.constant 0 : index
    %c0_6 = arith.constant 0 : index
    %7 = vector.load %arg4[%c0_5, %c0_6] : memref<16x1xf32, #tpu.memory_space<vmem>>, vector<16x1xf32>
    %8 = vector.broadcast %7 : vector<16x1xf32> to vector<16x128xf32>
    %9 = arith.addf %6, %8 : vector<16x128xf32>
    %cst_7 = arith.constant 0.000000e+00 : f32
    %10 = vector.broadcast %cst_7 : f32 to vector<16x128xf32>
    %11 = arith.maximumf %9, %10 : vector<16x128xf32>
    %c128_i32 = arith.constant 128 : i32
    %12 = arith.muli %arg1, %c128_i32 : i32
    %13 = tpu.iota {dimensions = array<i32: 1>} : vector<1x128xi32>
    %14 = vector.broadcast %12 : i32 to vector<1x128xi32>
    %15 = arith.addi %14, %13 : vector<1x128xi32>
    %c192_i32 = arith.constant 192 : i32
    %16 = vector.broadcast %c192_i32 : i32 to vector<1x128xi32>
    %17 = arith.cmpi slt, %15, %16 : vector<1x128xi32>
    %cst_8 = arith.constant 0.000000e+00 : f32
    %18 = vector.shape_cast %17 : vector<1x128xi1> to vector<1x128xi1>
    %19 = vector.broadcast %18 : vector<1x128xi1> to vector<16x128xi1>
    %20 = vector.broadcast %cst_8 : f32 to vector<16x128xf32>
    %21 = arith.select %19, %11, %20 : vector<16x128xi1>, vector<16x128xf32>
    %c0_9 = arith.constant 0 : index
    %c0_10 = arith.constant 0 : index
    %22 = vector.load %arg6[%c0_9, %c0_10] : memref<16x1xf32, #tpu.memory_space<vmem>>, vector<16x1xf32>
    %cst_11 = arith.constant dense<0.000000e+00> : vector<16xf32>
    %23 = vector.multi_reduction <add>, %21, %cst_11 [1] : vector<16x128xf32> to vector<16xf32>
    %24 = vector.shape_cast %23 : vector<16xf32> to vector<16x1xf32>
    %25 = arith.addf %22, %24 : vector<16x1xf32>
    %c0_12 = arith.constant 0 : index
    %c0_13 = arith.constant 0 : index
    %26 = vector.load %arg6[%c0_12, %c0_13] : memref<16x1xf32, #tpu.memory_space<vmem>>, vector<16x1xf32>
    tpu.vector_store %arg6[%c0_12, %c0_13], %25 {strides = array<i32>} : memref<16x1xf32, #tpu.memory_space<vmem>>, vector<16x1xf32>,
    %c1_i32 = arith.constant 1 : i32
    %27 = arith.cmpi eq, %arg1, %c1_i32 : i32
    %28 = arith.extui %27 : i1 to i32
    %c0_i32_14 = arith.constant 0 : i32
    %29 = arith.cmpi ne, %28, %c0_i32_14 : i32
    scf.if %29 {
      %c0_15 = arith.constant 0 : index
      %c0_16 = arith.constant 0 : index
      %30 = vector.load %arg6[%c0_15, %c0_16] : memref<16x1xf32, #tpu.memory_space<vmem>>, vector<16x1xf32>
      %cst_17 = arith.constant 0.00520833349 : f32
      %31 = vector.broadcast %cst_17 : f32 to vector<16x1xf32>
      %32 = arith.mulf %30, %31 : vector<16x1xf32>
      %c0_18 = arith.constant 0 : index
      %c0_19 = arith.constant 0 : index
      %c0_20 = arith.constant 0 : index
      %33 = vector.load %arg5[%c0_18, %c0_19, %c0_20] : memref<1x16x1xf32, #tpu.memory_space<vmem>>, vector<1x16x1xf32>
      %34 = vector.shape_cast %33 : vector<1x16x1xf32> to vector<16x1xf32>
      %35 = vector.shape_cast %32 : vector<16x1xf32> to vector<1x16x1xf32>
      tpu.vector_store %arg5[%c0_18, %c0_19, %c0_20], %35 {strides = array<i32>} : memref<1x16x1xf32, #tpu.memory_space<vmem>>, vector<1x16x1xf32>,
    } else {
    }
    return
  }
  func.func @transform_0(%arg0: i32, %arg1: i32) -> (i32, i32, i32) {
    %c0_i32 = arith.constant 0 : i32
    %c0_i32_0 = arith.constant 0 : i32
    return %arg0, %c0_i32, %arg1 : i32, i32, i32
  }
  func.func @transform_1(%arg0: i32, %arg1: i32) -> (i32, i32) {
    %c0_i32 = arith.constant 0 : i32
    %c0_i32_0 = arith.constant 0 : i32
    %c0_i32_1 = arith.constant 0 : i32
    return %c0_i32, %c0_i32_0 : i32, i32
  }
  func.func @transform_2(%arg0: i32, %arg1: i32) -> (i32, i32) {
    %c0_i32 = arith.constant 0 : i32
    %c0_i32_0 = arith.constant 0 : i32
    %c0_i32_1 = arith.constant 0 : i32
    return %c0_i32, %c0_i32_0 : i32, i32
  }
  func.func @transform_3(%arg0: i32, %arg1: i32) -> (i32, i32, i32) {
    %c0_i32 = arith.constant 0 : i32
    %c0_i32_0 = arith.constant 0 : i32
    %c0_i32_1 = arith.constant 0 : i32
    return %arg0, %c0_i32, %c0_i32_0 : i32, i32, i32
  }
}

</mosaic_0001>

<bundles_post_ra>
// kernel: tpu_custom_call.1
= control target key start
LH: loop header
LB: loop body
LE: loop exit
PB: predicated region body
PF: predicated region fallthrough
CT: control target
= control target key end

     0   :  { %s628_s12 = smov 0   ;;  %s630_s13 = smov 0   ;;  %s733_s0 = inlined_call_operand.vmem [shape: bf16[2,36,256], index: 0, kind: input, shape index: {}]   ;;  %s734_s1 = inlined_call_operand.vmem [shape: bf16[16,36], index: 1, kind: input, shape index: {}]   ;;  %s735_s2 = inlined_call_operand.vmem [shape: f32[16,1], index: 2, kind: input, shape index: {}]   ;;  %s736_s3 = inlined_call_operand.vmem [shape: f32[2,16,1], index: 3, kind: output, shape index: {}]  }
   0x1   :  { %s632_s14 = smov 0   ;;  %s634_s15 = smov 0  }
   0x2   :  { %s636_s16 = smov 0   ;;  %s638_s17 = smov 0  }
   0x3   :  { %s640_s18 = smov 0  }
   0x4 LB: > { %s22_s19 = sadd.s32 1, %s594_s16  ;;  %s25_s20 = sadd.s32 1, %s598_s17  ;;  %s602_s18 = sphi %s640_s18, %s13_s18   ;;  %s598_s17 = sphi %s638_s17, %s742_s17   ;;  %s594_s16 = sphi %s636_s16, %s741_s16   ;;  %s590_s15 = sphi %s634_s15, %s740_s15   ;;  %s586_s14 = sphi %s632_s14, %s739_s14   ;;  %s582_s13 = sphi %s630_s13, %s738_s13   ;;  %s578_s12 = sphi %s628_s12, %s737_s12  }
   0x5   : > { %p23_p0 = scmp.ge.s32.totalorder %s22_s19, 2  ;;  %p41_p1 = scmp.ne.s32.totalorder %s582_s13, %s578_s12 }
   0x6   : > { %p42_p2 = scmp.eq.s32.totalorder %s602_s18, 0  ;;  %s34_s24 = sadd.s32 1, %s582_s13 }
   0x7   : > { %s744_s19 = smov (%p23_p0, %s22_s19), 0  ;;  %s746_s20 = smov (!%p23_p0, %s25_s20), %s598_s17 }
   0x8   : > { %p43_p3 = por %p42_p2, %p41_p1  ;;  %p27_p4 = scmp.ge.s32.totalorder %s746_s20, 2 }
   0x9   : > { %s30_s21 = ssub.s32 %s594_s16, %s744_s19  ;;  %p450_p6 = scmp.ge.s32.totalorder %s602_s18, 4 }
   0xa   : > { %s748_s20 = smov (%p27_p4, %s746_s20), 0 }
   0xb   : > { %s29_s22 = ssub.s32 %s598_s17, %s748_s20  ;;  %141 = sbr.rel (%p450_p6) target bundleno = 28 (0x1c), region = 24 }
   0xc   : > { %s31_s23 = sor.u32 %s30_s21, %s29_s22 }
   0xd   : > { %p32_p5 = scmp.eq.s32.totalorder %s31_s23, 0 }
   0xf   : > { %s679_s25 = scalar_select %p32_p5, %s582_s13, %s34_s24  }
  0x12   : > { %144 = sbr.rel (!%p43_p3) target bundleno = 28 (0x1c), region = 28  ;;  %s146_s26 = sand.u32 (%p43_p3), 1, %s582_s13  }
  0x13   : > { %s481_s27 = smul.u32 (%p43_p3), 10, %s598_s17 }
  0x14   : > { %s480_s28 = smul.u32 (%p43_p3), 20, %s146_s26 }
  0x15   : > { %s150_s29 = sadd.s32 (%p43_p3), %s594_s16, %s481_s27 }
  0x16   : > { %s451_s30 = sshll.u32 (%p43_p3), %s150_s29, 2  ;;  %s148_s7 = scalar_lea.vmem (%p43_p3), [#allocation3], %s480_s28 }
  0x17   : > { %s152_s6 = scalar_lea.vmem (%p43_p3), %s733_s0, %s451_s30 }
  0x18   : > { %v168_v0 = vld [vmem:[%s152_s6] sm:$0xf] (%p43_p3)  ;;  %v170_v1 = vld [vmem:[%s152_s6 + $0x8] sm:$0xf] (%p43_p3)  ;;  %v172_v2 = vld [vmem:[%s152_s6 + $0x10] sm:$0xf] (%p43_p3) }
  0x19   : > { %169 = vst [vmem:[%s148_s7] sm:$0xf] %v168_v0  ;;  %171 = vst [vmem:[%s148_s7 + $0x4] sm:$0xf] %v170_v1  ;;  %v174_v3 = vld [vmem:[%s152_s6 + $0x18] sm:$0xf] }
  0x1a   : > { %173 = vst [vmem:[%s148_s7 + $0x8] sm:$0xf] %v172_v2  ;;  %v176_v4 = vld [vmem:[%s152_s6 + $0x20] sm:$0xf]  ;;  %175 = vst [vmem:[%s148_s7 + $0xc] sm:$0xf] %v174_v3 }
  0x1b   : > { %177 = vst [vmem:[%s148_s7 + $0x10] sm:$0xf] %v176_v4 }
  0x1c PF: > { %p452_p7 = scmp.ge.s32.totalorder %s602_s18, 1  ;;  %p209_p8 = scmp.lt.s32.totalorder %s602_s18, 5 }
  0x1e   : > { %p210_p9 = pnand %p452_p7, %p209_p8 }
  0x1f   : > { %s216_s8 = sand.u32 (!%p210_p9), 1, %s578_s12   ;;  %p239_p10 = scmp.lt.s32.totalorder (!%p210_p9), %s590_s15, 1 }
  0x20   : > { %213 = sbr.rel (%p210_p9) target bundleno = 435 (0x1b3), region = 69  ;;  %p455_p11 = scmp.ne.s32.totalorder (!%p210_p9), %s586_s14, 0 }
  0x21   : > { %s482_s9 = smul.u32 (!%p210_p9), 20, %s216_s8 }
  0x23   : > { %s218_s23 = scalar_lea.vmem (!%p210_p9), [#allocation3], %s482_s9 }
  0x27   : > { %s750_s15 = smov (!%p239_p10, %s590_s15), 1  ;;  %248 = sbr.rel (%p455_p11) target bundleno = 46 (0x2e), region = 77 }
  0x28   : > { %s465_s10 = sshll.u32 %s750_s15, 4  ;;  %vm249_vm0 = vcmask (!%p455_p11), 7168   ;;  %v604_v5 = vmov (!%p455_p11), 0.0  }
  0x29   : > { %s696_s22 = scalar_lea.vmem %s736_s3, %s465_s10  ;;  %250 = vst.msk [vmem:[#allocation2] sm:$0xff] (!%p455_p11), %vm249_vm0, %v604_v5  ;;  %251 = vst.msk [vmem:[#allocation2 + $0x8] sm:$0xff] (!%p455_p11), %vm249_vm0, %v604_v5 }
  0x2e PF: > { %v544_v6 = vld [vmem:[%s218_s23] sm:$0xff]   ;;  %v605_v7 = vmov 0.0   ;;  %v545_v8 = vld [vmem:[%s218_s23 + $0x8] sm:$0xff]   ;;  %v546_v9 = vld [vmem:[%s218_s23 + $0x10] ss:$0 sps:$4 sm:$0x33]   ;;  %v343_v15 = vlaneseq }
  0x2f   : > { %470 = vmatprep.subr.bf16.mxu0 %v605_v7  ;;  %vm606_vm1 = vmmov 0   ;;  %vm295_vm2 = vcmask 1041408   ;;  %v259_v10 = vld [vmem:[%s735_s2] sm:$0xff]  ;;  %v607_v11 = vmov 0   ;;  %v260_v13 = vld [vmem:[%s735_s2 + $0x8] sm:$0xff]  ;;  %vm291_vm3 = vcmask 293888  }
  0x30   : > { %471 = vmatpush3.bf16.msra.mxu0 %v544_v6  ;;  %476 = vmatprep.mubr.msk.bf16.mxu0 %vm606_vm1, %v605_v7  ;;  %v297_v12 = vsel %vm295_vm2, %v546_v9, 0  ;;  %v547_v14 = vld [vmem:[%s734_s1] sm:$0xff]   ;;  %s461_s29 = sshll.u32 %s586_s14, 7  ;;  %v344_v16 = vand.u32 127, %v343_v15  ;;  %vm360_vm5 = vcmask 7168   ;;  %v353_v34 = vld [vmem:[#allocation2 + $0x8] sm:$0xff] }
  0x31   : > { %472 = vmatprep.subr.bf16.mxu0 %v605_v7  ;;  %543 = vset.pattern.permute.xlu0 %v607_v11  ;;  %v345_v17 = vstv %s461_s29  ;;  %v352_v31 = vld [vmem:[#allocation2] sm:$0xff]  ;;  %p462_p12 = scmp.ne.s32.totalorder %s586_s14, 1 }
  0x32   : > { %263 = vperm.xlu0 %543, %v259_v10   ;;  %v346_v19 = vadd.s32 %v345_v17, %v344_v16 }
  0x34   : > { %473 = vmatpush3.bf16.msra.mxu0 %v545_v8  ;;  %vm347_vm4 = vcmp.lt.s32.totalorder %v346_v19, 192 }
  0x35   : > { %474 = vmatprep.subr.bf16.mxu0 %v605_v7 }
  0x36   : > { %268 = vperm.xlu0 %543, %v260_v13  }
  0x38   : > { %475 = vmatpush3.bf16.msra.mxu0 %v297_v12 }
  0x3b   : > { %477 = vmatmul.mubr.msk.bf16.vlgmr.msra.gmra.mrb[0].mxu0 %vm291_vm3, %v547_v14 }
  0xb1   : > { %v264_v18 = vpop.permute.xlu0 %263 }
  0xb5   : > { %v269_v23 = vpop.permute.xlu0 %268 }
 0x10e   : > { %v333_v20 = vpop.f32.mrb[0].mxu0 }
 0x10f   : > { %v334_v21 = vadd.f32 %v333_v20, %v264_v18  ;;  %v478_v22 = vpop.f32.mrb[1].mxu0 }
 0x110   : > { %v336_v24 = vpop.f32.mrb[2].mxu0 }
 0x111   : > { %v340_v25 = vmax.f32 %v334_v21, 0.0  ;;  %v337_v26 = vadd.f32 %v336_v24, %v269_v23  ;;  %v479_v27 = vpop.f32.mrb[3].mxu0 }
 0x113   : > { %v341_v28 = vmax.f32 %v337_v26, 0.0  ;;  %v350_v29 = vsel %vm347_vm4, %v340_v25, 0.0 }
 0x114   : > { %354 = vadd.xlane.f32.xlu1 %v350_v29 }
 0x115   : > { %v351_v30 = vsel %vm347_vm4, %v341_v28, 0.0 }
 0x118   : > { %356 = vadd.xlane.f32.xlu1 %v351_v30 }
 0x1a1   : > { %v355_v32 = vpop.xlane.xlu1 %354 }
 0x1a2   : > { %v358_v33 = vadd.f32 %v355_v32, %v352_v31  ;;  %366 = sbr.rel (%p462_p12) target bundleno = 435 (0x1b3), region = 81 }
 0x1a4   : > { %361 = vst.msk [vmem:[#allocation2] sm:$0xff] %vm360_vm5, %v358_v33 }
 0x1a5   : > { %v357_v35 = vpop.xlane.xlu1 %356 }
 0x1a6   : > { %v359_v36 = vadd.f32 %v357_v35, %v353_v34 }
 0x1a8   : > { %362 = vst.msk [vmem:[#allocation2 + $0x8] sm:$0xff] %vm360_vm5, %v359_v36 }
 0x1ab   : > { %v367_v37 = vld [vmem:[#allocation2] sm:$0xff] }
 0x1ac   : > { %v369_v39 = vmul.f32 0.0052083335, %v367_v37 }
 0x1ae   : > { %371 = vst.msk [vmem:[%s696_s22] sm:$0xff] %vm360_vm5, %v369_v39 }
 0x1af   : > { %v368_v38 = vld [vmem:[#allocation2 + $0x8] sm:$0xff] }
 0x1b0   : > { %v370_v40 = vmul.f32 0.0052083335, %v368_v38 }
 0x1b2   : > { %372 = vst.msk [vmem:[%s696_s22 + $0x8] sm:$0xff] %vm360_vm5, %v370_v40 }
 0x1b3 PF: > { %s13_s18 = sadd.s32 1, %s602_s18   ;;  %s737_s12 = smov %s582_s13 }
 0x1b4   : > { %p10_p13 = scmp.ge.s32.totalorder %s13_s18, 6   ;;  %s738_s13 = smov %s679_s25 }
 0x1b5   : > { %s739_s14 = smov %s594_s16  ;;  %s740_s15 = smov %s598_s17 }
 0x1b6   : > { %s741_s16 = smov %s744_s19  ;;  %s742_s17 = smov %s748_s20 }
 0x1b7   :  { %12 = sbr.rel (!%p10_p13) target bundleno = 4 (0x4), region = 116 }

</bundles_post_ra>
